<compile_context>
chip_gen: v7x
topology: tpu7x:2x2x1
jax: 0.10.0
libtpu: 0.0.40
codegen_flags: <defaults>
</compile_context>

<pallas_src>
import functools

import jax
import jax.numpy as jnp
from jax.experimental import pallas as pl
from jax.experimental.pallas import tpu as pltpu


def _slice_copy_kernel(w_hbm, o_hbm, sem, *, ln):
    """Copy the leading `ln` rows of the weight table with one HBM->HBM DMA.

    w_hbm: (num_pos_feats, d_model) HBM ref (raw, no auto-DMA).
    o_hbm: (ln, d_model)            HBM ref (raw, no auto-DMA).
    sem:   DMA completion semaphore.
    """
    cp = pltpu.make_async_copy(
        w_hbm.at[pl.ds(0, ln), :],  # (ln, d_model) contiguous row range
        o_hbm,                      # (ln, d_model)
        sem,
    )
    cp.start()
    cp.wait()


def seq_embedding_learned(weight: jax.Array, ln: int) -> jax.Array:
    """Equivalent of SeqEmbeddingLearned.forward(ln).

    weight: (num_pos_feats, d_model) embedding table.
    ln:     static int, number of leading rows to take.
    returns (ln, 1, d_model), matching weight[:ln].unsqueeze(1).
    """
    num_pos_feats, d_model = weight.shape
    assert 0 < ln <= num_pos_feats

    itemsize = jnp.dtype(weight.dtype).itemsize
    kernel = functools.partial(_slice_copy_kernel, ln=ln)

    out2d = pl.pallas_call(
        kernel,
        out_shape=jax.ShapeDtypeStruct((ln, d_model), weight.dtype),
        grid_spec=pltpu.PrefetchScalarGridSpec(
            num_scalar_prefetch=0,
            grid=(1,),
            in_specs=[pl.BlockSpec(memory_space=pl.ANY)],   # weight stays in HBM
            out_specs=pl.BlockSpec(memory_space=pl.ANY),    # output written by DMA
            scratch_shapes=[pltpu.SemaphoreType.DMA(())],
        ),
        cost_estimate=pl.CostEstimate(
            flops=0,
            transcendentals=0,
            bytes_accessed=2 * ln * d_model * itemsize,     # read + write
        ),
        compiler_params=pltpu.CompilerParams(
            dimension_semantics=("arbitrary",),
        ),
    )(weight)

    # unsqueeze(1): metadata-only reshape of a row-major (ln, d_model) slab.
    return out2d[:, None, :]


if __name__ == "__main__":
    # Module hyper-params (small synthetic sizes).
    num_pos_feats = 16
    d_model = 32

    # Deterministic parameter init (nn.init.normal_ -> standard normal).
    key = jax.random.PRNGKey(0)
    weight = jax.random.normal(key, (num_pos_feats, d_model), dtype=jnp.float32)

    # Main check: ln = 8.
    ln = 8
    out = jax.block_until_ready(seq_embedding_learned(weight, ln))
    ref = weight[:ln][:, None, :]
    assert out.shape == (ln, 1, d_model), out.shape
    assert out.dtype == weight.dtype
    assert jnp.allclose(out, ref), "mismatch vs reference slice (ln=8)"

    # Secondary check: odd ln (no (8,128) constraint applies — pure HBM DMA).
    ln_odd = 5
    out_odd = jax.block_until_ready(seq_embedding_learned(weight, ln_odd))
    ref_odd = weight[:ln_odd][:, None, :]
    assert out_odd.shape == (ln_odd, 1, d_model), out_odd.shape
    assert jnp.allclose(out_odd, ref_odd), "mismatch vs reference slice (ln=5)"

    print("KERNEL_OK")
</pallas_src>

<mosaic_0001>
module attributes {stable_mosaic.version = 11 : i64} {
  func.func @_slice_copy_kernel(%arg0: i32, %arg1: memref<16x32xf32, #tpu.memory_space<any>>, %arg2: memref<8x32xf32, #tpu.memory_space<any>>, %arg3: memref<!tpu.dma_semaphore, #tpu.memory_space<semaphore_mem>>) attributes {dimension_semantics = [#tpu.dimension_semantics<arbitrary>], iteration_bounds = array<i64: 1>, scalar_prefetch = 0 : i64, scratch_operands = 1 : i64, tpu.core_type = #tpu.core_type<tc>, window_params = [{}, {}]} {
    %c0_i32 = arith.constant 0 : i32
    %c0_i32_0 = arith.constant 0 : i32
    %0 = tpu.memref_slice %arg1[%c0_i32, %c0_i32_0] : memref<16x32xf32, #tpu.memory_space<any>> -> memref<8x32xf32, #tpu.memory_space<any>>
    tpu.enqueue_dma source(%0 : memref<8x32xf32, #tpu.memory_space<any>>) target(%arg2 : memref<8x32xf32, #tpu.memory_space<any>>) target_semaphore(%arg3 : memref<!tpu.dma_semaphore, #tpu.memory_space<semaphore_mem>>)
    %c0_i32_1 = arith.constant 0 : i32
    %c0_i32_2 = arith.constant 0 : i32
    %1 = tpu.memref_slice %arg1[%c0_i32_1, %c0_i32_2] : memref<16x32xf32, #tpu.memory_space<any>> -> memref<8x32xf32, #tpu.memory_space<any>>
    tpu.wait_dma2 semaphore(%arg3 : memref<!tpu.dma_semaphore, #tpu.memory_space<semaphore_mem>>) src(%1 : memref<8x32xf32, #tpu.memory_space<any>>) dst(%arg2 : memref<8x32xf32, #tpu.memory_space<any>>)
    return
  }
}

</mosaic_0001>

<bundles_post_ra>
// kernel: tpu_custom_call.1
= control target key start
LH: loop header
LB: loop body
LE: loop exit
PB: predicated region body
PF: predicated region fallthrough
CT: control target
= control target key end

     0   :  { %s34_s6 = smov [#allocation2]   ;;  %s35_s7 = smov [#allocation3]   ;;  %s53_s0 = inlined_call_operand.hbm [shape: f32[16,32], index: 0, kind: input, shape index: {}]   ;;  %s54_s1 = inlined_call_operand.hbm [shape: f32[8,32], index: 1, kind: output, shape index: {}]  }
   0x1   :  { %s36_s8 = smov 0  }
   0x2   :  { %18 = dma.general %s53_s0, 128, %s54_s1, %s34_s6, %s35_s7, [#allocation4], %s36_s8, 0  }
   0x3   :  { %32 = dma.done.wait [#allocation2], 128 }
   0x4   :  { %33 = vsyncadd [#allocation2], 4294967168 }
   0x5   :  { %22 = vsyncmov [#allocation2] }
   0x8   :  { %s23_s13 = vpop.sfrf %22 }
   0x9   :  { %p28_p0 = scmp.ne.s32.totalorder %s23_s13, 0 }
   0xb   :  { %27 = shalt.err (%p28_p0)  }

</bundles_post_ra>
